<compile_context>
chip_gen: v7x
topology: tpu7x:2x2x1
jax: 0.10.0
libtpu: 0.0.40
codegen_flags: <defaults>
</compile_context>

<pallas_src>
import math

import jax
import jax.numpy as jnp
from jax.experimental import pallas as pl
from jax.experimental.pallas import tpu as pltpu

# ----- problem sizes (small, consistent with the module) ---------------------
B = 8          # batch
D = 16         # feature dim (== input_shape)
DH = D // 2    # half-features seen by s_net / t_net
H = 32         # hidden width of s_net / t_net
H2 = 2 * H     # fused hidden width (s-hidden | t-hidden)
NUM_FLOWS = 5


# ----------------------------- Pallas kernel ---------------------------------
def nvp_kernel(xa_ref, xb_ref,
               w1a_ref, w1b_ref, b1_ref,
               w2a_ref, w2b_ref, b2a_ref, b2b_ref,
               nll_ref):
    # Batch is on the lane axis: every tile below is lane-dense (last dim = bt).
    bt = xa_ref.shape[1]

    u = xa_ref[...]                            # (DH, bt)  "xa" up to a folded reversal
    v = xb_ref[...]                            # (DH, bt)  "xb" up to a folded reversal

    # Hoist weight loads and bias broadcasts out of the (static) flow loop.
    W1 = (w1a_ref[...], w1b_ref[...])          # (H2, DH)  parity 0 / 1 variants
    W2 = (w2a_ref[...], w2b_ref[...])          # (D, H2)   block-diagonal, parity 0 / 1
    b1 = jnp.broadcast_to(b1_ref[...], (H2, bt))
    b2 = (jnp.broadcast_to(b2a_ref[...], (D, bt)),
          jnp.broadcast_to(b2b_ref[...], (D, bt)))

    log_j = jnp.zeros((1, bt), jnp.float32)

    for i in range(NUM_FLOWS):                 # static unroll (5 flows)
        p = i % 2                              # parity: which pre-reversed weight variant
        # fused first layers of s_net and t_net (one MXU push, N = bt lanes)
        h = jnp.tanh(jnp.dot(W1[p], u, preferred_element_type=jnp.float32) + b1)   # (H2, bt)
        # fused (block-diagonal) second layers: st = [s_pre ; t]  (one MXU push)
        st = jnp.dot(W2[p], h, preferred_element_type=jnp.float32) + b2[p]         # (D, bt)
        s = jnp.tanh(st[:DH, :])               # (DH, bt)  sublane-aligned slice
        t = st[DH:, :]                         # (DH, bt)

        yb = (v - t) * jnp.exp(-s)             # coupling (forward pass)
        log_j = log_j - jnp.sum(s, axis=0, keepdims=True)   # cheap sublane reduction

        # flip(z, dim=1) == swap halves + reverse each half; the reversal is
        # folded into the next flow's weight variant, so only swap here.
        u, v = yb, u

    # standard-normal prior log_prob; ||z||^2 is reversal-invariant so the
    # carried (possibly reversed) halves give the exact value.
    log_prob = (-0.5 * D * math.log(2.0 * math.pi)
                - 0.5 * (jnp.sum(u * u, axis=0, keepdims=True)
                         + jnp.sum(v * v, axis=0, keepdims=True)))
    nll_ref[...] = -(log_prob + log_j)         # (1, bt) lane-dense per-sample NLL


# ------------------------- host-side weight prep ------------------------------
def prepare_params(params):
    """Fuse s/t nets, build parity-1 (reversal-folded) variants, and transpose
    everything for the batch-on-lanes kernel layout."""
    w1s, b1s, w2s, b2s, w1t, b1t, w2t, b2t = params

    W1 = jnp.concatenate([w1s, w1t], axis=1)                 # (DH, 2H)
    b1 = jnp.concatenate([b1s, b1t], axis=1)                 # (1, 2H)

    W2 = jnp.zeros((H2, D), jnp.float32)                     # block-diagonal
    W2 = W2.at[:H, :DH].set(w2s).at[H:, DH:].set(w2t)        # (2H, D) -> [s_pre | t]
    b2 = jnp.concatenate([b2s, b2t], axis=1)                 # (1, D)

    def rev_half_cols(m):                                    # reverse cols within each DH block
        return jnp.concatenate([m[:, :DH][:, ::-1], m[:, DH:][:, ::-1]], axis=1)

    W1_B = W1[::-1, :]                                       # reversed input rows
    W2_B = rev_half_cols(W2)
    b2_B = rev_half_cols(b2)

    # Transposed for (features, batch) compute: W1^T (H2, DH), W2^T (D, H2),
    # biases as column vectors (broadcast along lanes in-kernel).
    return (W1.T, W1_B.T, b1.T,                              # (H2,DH),(H2,DH),(H2,1)
            W2.T, W2_B.T, b2.T, b2_B.T)                      # (D,H2),(D,H2),(D,1),(D,1)


# ------------------------------ wrapper ---------------------------------------
def _pick_batch_tile(bsz):
    # Lane-aligned tile: at least 128 (one full vreg of lanes), at most 1024
    # (amortizes per-grid-step overhead; stays far below VMEM limits on all
    # generations, and never falls back to bt == bsz).
    rounded = ((bsz + 127) // 128) * 128
    return min(1024, rounded)


@jax.jit
def nvp_forward(x, params):
    """Full flow + loss; the 5 coupling/permutation flows run in one Pallas kernel."""
    W1A, W1B, b1, W2A, W2B, b2A, b2B = prepare_params(params)

    bsz = x.shape[0]
    bt = _pick_batch_tile(bsz)
    n_tiles = pl.cdiv(bsz, bt)
    padded = n_tiles * bt

    xT = x.T                                                  # (D, bsz) batch on lanes
    xa = xT[:DH, :]
    xb = xT[DH:, :]
    if padded != bsz:                                         # zero-pad padded columns
        xa = jnp.pad(xa, ((0, 0), (0, padded - bsz)))
        xb = jnp.pad(xb, ((0, 0), (0, padded - bsz)))

    batch_spec = pl.BlockSpec((DH, bt), lambda i: (0, i))
    full = lambda a: pl.BlockSpec(a.shape, lambda i: (0, 0))   # weights stay resident

    nll = pl.pallas_call(
        nvp_kernel,
        out_shape=jax.ShapeDtypeStruct((1, padded), jnp.float32),
        grid=(n_tiles,),
        in_specs=[batch_spec, batch_spec,
                  full(W1A), full(W1B), full(b1),
                  full(W2A), full(W2B), full(b2A), full(b2B)],
        out_specs=pl.BlockSpec((1, bt), lambda i: (0, i)),     # lane-dense output row
        compiler_params=pltpu.CompilerParams(
            dimension_semantics=("parallel",)),
    )(xa, xb, W1A, W1B, b1, W2A, W2B, b2A, b2B)

    # reduction='avg'; mask out padded samples.
    return jnp.sum(nll[0, :bsz]) / bsz


# ------------------------------ reference -------------------------------------
def ref_forward(x, params):
    """Pure-JAX reference mirroring the PyTorch forward (reduction='avg')."""
    w1s, b1s, w2s, b2s, w1t, b1t, w2t, b2t = params
    z = x
    log_j = jnp.zeros((x.shape[0],), jnp.float32)
    for _ in range(NUM_FLOWS):
        xa, xb = z[:, :DH], z[:, DH:]
        s = jnp.tanh(jnp.tanh(xa @ w1s + b1s) @ w2s + b2s)
        t = jnp.tanh(xa @ w1t + b1t) @ w2t + b2t
        yb = (xb - t) * jnp.exp(-s)
        z = jnp.concatenate([xa, yb], axis=1)
        z = jnp.flip(z, axis=1)
        log_j = log_j - jnp.sum(s, axis=1)
    log_prob = -0.5 * D * math.log(2.0 * math.pi) - 0.5 * jnp.sum(z * z, axis=1)
    return -(log_prob + log_j).mean()


def init_params(key):
    ks = jax.random.split(key, 8)
    scale = 0.2
    w1s = scale * jax.random.normal(ks[0], (DH, H), jnp.float32)
    b1s = scale * jax.random.normal(ks[1], (1, H), jnp.float32)
    w2s = scale * jax.random.normal(ks[2], (H, DH), jnp.float32)
    b2s = scale * jax.random.normal(ks[3], (1, DH), jnp.float32)
    w1t = scale * jax.random.normal(ks[4], (DH, H), jnp.float32)
    b1t = scale * jax.random.normal(ks[5], (1, H), jnp.float32)
    w2t = scale * jax.random.normal(ks[6], (H, DH), jnp.float32)
    b2t = scale * jax.random.normal(ks[7], (1, DH), jnp.float32)
    return (w1s, b1s, w2s, b2s, w1t, b1t, w2t, b2t)


if __name__ == "__main__":
    key = jax.random.PRNGKey(0)
    k_params, k_x = jax.random.split(key)
    params = init_params(k_params)
    x = jax.random.normal(k_x, (B, D), jnp.float32)

    loss = jax.block_until_ready(nvp_forward(x, params))
    ref = jax.block_until_ready(ref_forward(x, params))
    assert jnp.allclose(loss, ref, atol=1e-4, rtol=1e-4), (loss, ref)

    print("KERNEL_OK")
</pallas_src>

<mosaic_0001>
module attributes {stable_mosaic.version = 11 : i64} {
  func.func @nvp_kernel(%arg0: i32, %arg1: memref<8x128xf32, #tpu.memory_space<vmem>>, %arg2: memref<8x128xf32, #tpu.memory_space<vmem>>, %arg3: memref<64x8xf32, #tpu.memory_space<vmem>>, %arg4: memref<64x8xf32, #tpu.memory_space<vmem>>, %arg5: memref<64x1xf32, #tpu.memory_space<vmem>>, %arg6: memref<16x64xf32, #tpu.memory_space<vmem>>, %arg7: memref<16x64xf32, #tpu.memory_space<vmem>>, %arg8: memref<16x1xf32, #tpu.memory_space<vmem>>, %arg9: memref<16x1xf32, #tpu.memory_space<vmem>>, %arg10: memref<1x128xf32, #tpu.memory_space<vmem>>) attributes {dimension_semantics = [#tpu.dimension_semantics<parallel>], iteration_bounds = array<i64: 1>, scalar_prefetch = 0 : i64, scratch_operands = 0 : i64, tpu.core_type = #tpu.core_type<tc>, window_params = [{transform_indices = @transform_0, window_bounds = array<i64: 8, 128>}, {transform_indices = @transform_1, window_bounds = array<i64: 8, 128>}, {pipeline_mode = #tpu.pipeline_mode<synchronous>, transform_indices = @transform_2, window_bounds = array<i64: 64, 8>}, {pipeline_mode = #tpu.pipeline_mode<synchronous>, transform_indices = @transform_3, window_bounds = array<i64: 64, 8>}, {pipeline_mode = #tpu.pipeline_mode<synchronous>, transform_indices = @transform_4, window_bounds = array<i64: 64, 1>}, {pipeline_mode = #tpu.pipeline_mode<synchronous>, transform_indices = @transform_5, window_bounds = array<i64: 16, 64>}, {pipeline_mode = #tpu.pipeline_mode<synchronous>, transform_indices = @transform_6, window_bounds = array<i64: 16, 64>}, {pipeline_mode = #tpu.pipeline_mode<synchronous>, transform_indices = @transform_7, window_bounds = array<i64: 16, 1>}, {pipeline_mode = #tpu.pipeline_mode<synchronous>, transform_indices = @transform_8, window_bounds = array<i64: 16, 1>}, {transform_indices = @transform_9, window_bounds = array<i64: 1, 128>}]} {
    %c0 = arith.constant 0 : index
    %c0_0 = arith.constant 0 : index
    %0 = vector.load %arg1[%c0, %c0_0] : memref<8x128xf32, #tpu.memory_space<vmem>>, vector<8x128xf32>
    %c0_1 = arith.constant 0 : index
    %c0_2 = arith.constant 0 : index
    %1 = vector.load %arg2[%c0_1, %c0_2] : memref<8x128xf32, #tpu.memory_space<vmem>>, vector<8x128xf32>
    %c0_3 = arith.constant 0 : index
    %c0_4 = arith.constant 0 : index
    %2 = vector.load %arg3[%c0_3, %c0_4] : memref<64x8xf32, #tpu.memory_space<vmem>>, vector<64x8xf32>
    %c0_5 = arith.constant 0 : index
    %c0_6 = arith.constant 0 : index
    %3 = vector.load %arg4[%c0_5, %c0_6] : memref<64x8xf32, #tpu.memory_space<vmem>>, vector<64x8xf32>
    %c0_7 = arith.constant 0 : index
    %c0_8 = arith.constant 0 : index
    %4 = vector.load %arg6[%c0_7, %c0_8] : memref<16x64xf32, #tpu.memory_space<vmem>>, vector<16x64xf32>
    %c0_9 = arith.constant 0 : index
    %c0_10 = arith.constant 0 : index
    %5 = vector.load %arg7[%c0_9, %c0_10] : memref<16x64xf32, #tpu.memory_space<vmem>>, vector<16x64xf32>
    %c0_11 = arith.constant 0 : index
    %c0_12 = arith.constant 0 : index
    %6 = vector.load %arg5[%c0_11, %c0_12] : memref<64x1xf32, #tpu.memory_space<vmem>>, vector<64x1xf32>
    %7 = vector.shape_cast %6 : vector<64x1xf32> to vector<64x1xf32>
    %8 = vector.broadcast %7 : vector<64x1xf32> to vector<64x128xf32>
    %c0_13 = arith.constant 0 : index
    %c0_14 = arith.constant 0 : index
    %9 = vector.load %arg8[%c0_13, %c0_14] : memref<16x1xf32, #tpu.memory_space<vmem>>, vector<16x1xf32>
    %10 = vector.shape_cast %9 : vector<16x1xf32> to vector<16x1xf32>
    %11 = vector.broadcast %10 : vector<16x1xf32> to vector<16x128xf32>
    %c0_15 = arith.constant 0 : index
    %c0_16 = arith.constant 0 : index
    %12 = vector.load %arg9[%c0_15, %c0_16] : memref<16x1xf32, #tpu.memory_space<vmem>>, vector<16x1xf32>
    %13 = vector.shape_cast %12 : vector<16x1xf32> to vector<16x1xf32>
    %14 = vector.broadcast %13 : vector<16x1xf32> to vector<16x128xf32>
    %cst = arith.constant 0.000000e+00 : f32
    %15 = vector.broadcast %cst : f32 to vector<1x128xf32>
    %cst_17 = arith.constant dense<0.000000e+00> : vector<64x128xf32>
    %16 = tpu.matmul %2, %0, %cst_17 {dimension_numbers = #tpu.dot_dimension_numbers<[1], [0], [0], [1], [0, 0, 1, 1], [], []>} : vector<64x8xf32>, vector<8x128xf32>, vector<64x128xf32> -> vector<64x128xf32>
    %17 = arith.addf %16, %8 : vector<64x128xf32>
    %18 = math.tanh %17 : vector<64x128xf32>
    %cst_18 = arith.constant dense<0.000000e+00> : vector<16x128xf32>
    %19 = tpu.matmul %4, %18, %cst_18 {dimension_numbers = #tpu.dot_dimension_numbers<[1], [0], [0], [1], [0, 0, 1, 1], [], []>} : vector<16x64xf32>, vector<64x128xf32>, vector<16x128xf32> -> vector<16x128xf32>
    %20 = arith.addf %19, %11 : vector<16x128xf32>
    %21 = vector.extract_strided_slice %20 {offsets = [0, 0], sizes = [8, 128], strides = [1, 1]} : vector<16x128xf32> to vector<8x128xf32>
    %22 = math.tanh %21 : vector<8x128xf32>
    %23 = vector.extract_strided_slice %20 {offsets = [8, 0], sizes = [8, 128], strides = [1, 1]} : vector<16x128xf32> to vector<8x128xf32>
    %24 = arith.subf %1, %23 : vector<8x128xf32>
    %cst_19 = arith.constant 0.000000e+00 : f32
    %25 = vector.broadcast %cst_19 : f32 to vector<8x128xf32>
    %26 = arith.subf %25, %22 : vector<8x128xf32>
    %27 = math.exp %26 : vector<8x128xf32>
    %28 = arith.mulf %24, %27 : vector<8x128xf32>
    %cst_20 = arith.constant dense<0.000000e+00> : vector<128xf32>
    %29 = vector.multi_reduction <add>, %22, %cst_20 [0] : vector<8x128xf32> to vector<128xf32>
    %30 = vector.shape_cast %29 : vector<128xf32> to vector<1x128xf32>
    %31 = arith.subf %15, %30 : vector<1x128xf32>
    %cst_21 = arith.constant dense<0.000000e+00> : vector<64x128xf32>
    %32 = tpu.matmul %3, %28, %cst_21 {dimension_numbers = #tpu.dot_dimension_numbers<[1], [0], [0], [1], [0, 0, 1, 1], [], []>} : vector<64x8xf32>, vector<8x128xf32>, vector<64x128xf32> -> vector<64x128xf32>
    %33 = arith.addf %32, %8 : vector<64x128xf32>
    %34 = math.tanh %33 : vector<64x128xf32>
    %cst_22 = arith.constant dense<0.000000e+00> : vector<16x128xf32>
    %35 = tpu.matmul %5, %34, %cst_22 {dimension_numbers = #tpu.dot_dimension_numbers<[1], [0], [0], [1], [0, 0, 1, 1], [], []>} : vector<16x64xf32>, vector<64x128xf32>, vector<16x128xf32> -> vector<16x128xf32>
    %36 = arith.addf %35, %14 : vector<16x128xf32>
    %37 = vector.extract_strided_slice %36 {offsets = [0, 0], sizes = [8, 128], strides = [1, 1]} : vector<16x128xf32> to vector<8x128xf32>
    %38 = math.tanh %37 : vector<8x128xf32>
    %39 = vector.extract_strided_slice %36 {offsets = [8, 0], sizes = [8, 128], strides = [1, 1]} : vector<16x128xf32> to vector<8x128xf32>
    %40 = arith.subf %0, %39 : vector<8x128xf32>
    %cst_23 = arith.constant 0.000000e+00 : f32
    %41 = vector.broadcast %cst_23 : f32 to vector<8x128xf32>
    %42 = arith.subf %41, %38 : vector<8x128xf32>
    %43 = math.exp %42 : vector<8x128xf32>
    %44 = arith.mulf %40, %43 : vector<8x128xf32>
    %cst_24 = arith.constant dense<0.000000e+00> : vector<128xf32>
    %45 = vector.multi_reduction <add>, %38, %cst_24 [0] : vector<8x128xf32> to vector<128xf32>
    %46 = vector.shape_cast %45 : vector<128xf32> to vector<1x128xf32>
    %47 = arith.subf %31, %46 : vector<1x128xf32>
    %cst_25 = arith.constant dense<0.000000e+00> : vector<64x128xf32>
    %48 = tpu.matmul %2, %44, %cst_25 {dimension_numbers = #tpu.dot_dimension_numbers<[1], [0], [0], [1], [0, 0, 1, 1], [], []>} : vector<64x8xf32>, vector<8x128xf32>, vector<64x128xf32> -> vector<64x128xf32>
    %49 = arith.addf %48, %8 : vector<64x128xf32>
    %50 = math.tanh %49 : vector<64x128xf32>
    %cst_26 = arith.constant dense<0.000000e+00> : vector<16x128xf32>
    %51 = tpu.matmul %4, %50, %cst_26 {dimension_numbers = #tpu.dot_dimension_numbers<[1], [0], [0], [1], [0, 0, 1, 1], [], []>} : vector<16x64xf32>, vector<64x128xf32>, vector<16x128xf32> -> vector<16x128xf32>
    %52 = arith.addf %51, %11 : vector<16x128xf32>
    %53 = vector.extract_strided_slice %52 {offsets = [0, 0], sizes = [8, 128], strides = [1, 1]} : vector<16x128xf32> to vector<8x128xf32>
    %54 = math.tanh %53 : vector<8x128xf32>
    %55 = vector.extract_strided_slice %52 {offsets = [8, 0], sizes = [8, 128], strides = [1, 1]} : vector<16x128xf32> to vector<8x128xf32>
    %56 = arith.subf %28, %55 : vector<8x128xf32>
    %cst_27 = arith.constant 0.000000e+00 : f32
    %57 = vector.broadcast %cst_27 : f32 to vector<8x128xf32>
    %58 = arith.subf %57, %54 : vector<8x128xf32>
    %59 = math.exp %58 : vector<8x128xf32>
    %60 = arith.mulf %56, %59 : vector<8x128xf32>
    %cst_28 = arith.constant dense<0.000000e+00> : vector<128xf32>
    %61 = vector.multi_reduction <add>, %54, %cst_28 [0] : vector<8x128xf32> to vector<128xf32>
    %62 = vector.shape_cast %61 : vector<128xf32> to vector<1x128xf32>
    %63 = arith.subf %47, %62 : vector<1x128xf32>
    %cst_29 = arith.constant dense<0.000000e+00> : vector<64x128xf32>
    %64 = tpu.matmul %3, %60, %cst_29 {dimension_numbers = #tpu.dot_dimension_numbers<[1], [0], [0], [1], [0, 0, 1, 1], [], []>} : vector<64x8xf32>, vector<8x128xf32>, vector<64x128xf32> -> vector<64x128xf32>
    %65 = arith.addf %64, %8 : vector<64x128xf32>
    %66 = math.tanh %65 : vector<64x128xf32>
    %cst_30 = arith.constant dense<0.000000e+00> : vector<16x128xf32>
    %67 = tpu.matmul %5, %66, %cst_30 {dimension_numbers = #tpu.dot_dimension_numbers<[1], [0], [0], [1], [0, 0, 1, 1], [], []>} : vector<16x64xf32>, vector<64x128xf32>, vector<16x128xf32> -> vector<16x128xf32>
    %68 = arith.addf %67, %14 : vector<16x128xf32>
    %69 = vector.extract_strided_slice %68 {offsets = [0, 0], sizes = [8, 128], strides = [1, 1]} : vector<16x128xf32> to vector<8x128xf32>
    %70 = math.tanh %69 : vector<8x128xf32>
    %71 = vector.extract_strided_slice %68 {offsets = [8, 0], sizes = [8, 128], strides = [1, 1]} : vector<16x128xf32> to vector<8x128xf32>
    %72 = arith.subf %44, %71 : vector<8x128xf32>
    %cst_31 = arith.constant 0.000000e+00 : f32
    %73 = vector.broadcast %cst_31 : f32 to vector<8x128xf32>
    %74 = arith.subf %73, %70 : vector<8x128xf32>
    %75 = math.exp %74 : vector<8x128xf32>
    %76 = arith.mulf %72, %75 : vector<8x128xf32>
    %cst_32 = arith.constant dense<0.000000e+00> : vector<128xf32>
    %77 = vector.multi_reduction <add>, %70, %cst_32 [0] : vector<8x128xf32> to vector<128xf32>
    %78 = vector.shape_cast %77 : vector<128xf32> to vector<1x128xf32>
    %79 = arith.subf %63, %78 : vector<1x128xf32>
    %cst_33 = arith.constant dense<0.000000e+00> : vector<64x128xf32>
    %80 = tpu.matmul %2, %76, %cst_33 {dimension_numbers = #tpu.dot_dimension_numbers<[1], [0], [0], [1], [0, 0, 1, 1], [], []>} : vector<64x8xf32>, vector<8x128xf32>, vector<64x128xf32> -> vector<64x128xf32>
    %81 = arith.addf %80, %8 : vector<64x128xf32>
    %82 = math.tanh %81 : vector<64x128xf32>
    %cst_34 = arith.constant dense<0.000000e+00> : vector<16x128xf32>
    %83 = tpu.matmul %4, %82, %cst_34 {dimension_numbers = #tpu.dot_dimension_numbers<[1], [0], [0], [1], [0, 0, 1, 1], [], []>} : vector<16x64xf32>, vector<64x128xf32>, vector<16x128xf32> -> vector<16x128xf32>
    %84 = arith.addf %83, %11 : vector<16x128xf32>
    %85 = vector.extract_strided_slice %84 {offsets = [0, 0], sizes = [8, 128], strides = [1, 1]} : vector<16x128xf32> to vector<8x128xf32>
    %86 = math.tanh %85 : vector<8x128xf32>
    %87 = vector.extract_strided_slice %84 {offsets = [8, 0], sizes = [8, 128], strides = [1, 1]} : vector<16x128xf32> to vector<8x128xf32>
    %88 = arith.subf %60, %87 : vector<8x128xf32>
    %cst_35 = arith.constant 0.000000e+00 : f32
    %89 = vector.broadcast %cst_35 : f32 to vector<8x128xf32>
    %90 = arith.subf %89, %86 : vector<8x128xf32>
    %91 = math.exp %90 : vector<8x128xf32>
    %92 = arith.mulf %88, %91 : vector<8x128xf32>
    %cst_36 = arith.constant dense<0.000000e+00> : vector<128xf32>
    %93 = vector.multi_reduction <add>, %86, %cst_36 [0] : vector<8x128xf32> to vector<128xf32>
    %94 = vector.shape_cast %93 : vector<128xf32> to vector<1x128xf32>
    %95 = arith.subf %79, %94 : vector<1x128xf32>
    %96 = arith.mulf %92, %92 : vector<8x128xf32>
    %cst_37 = arith.constant dense<0.000000e+00> : vector<128xf32>
    %97 = vector.multi_reduction <add>, %96, %cst_37 [0] : vector<8x128xf32> to vector<128xf32>
    %98 = vector.shape_cast %97 : vector<128xf32> to vector<1x128xf32>
    %99 = arith.mulf %76, %76 : vector<8x128xf32>
    %cst_38 = arith.constant dense<0.000000e+00> : vector<128xf32>
    %100 = vector.multi_reduction <add>, %99, %cst_38 [0] : vector<8x128xf32> to vector<128xf32>
    %101 = vector.shape_cast %100 : vector<128xf32> to vector<1x128xf32>
    %102 = arith.addf %98, %101 : vector<1x128xf32>
    %cst_39 = arith.constant 5.000000e-01 : f32
    %103 = vector.broadcast %cst_39 : f32 to vector<1x128xf32>
    %104 = arith.mulf %103, %102 : vector<1x128xf32>
    %cst_40 = arith.constant -14.7030163 : f32
    %105 = vector.broadcast %cst_40 : f32 to vector<1x128xf32>
    %106 = arith.subf %105, %104 : vector<1x128xf32>
    %107 = arith.addf %106, %95 : vector<1x128xf32>
    %cst_41 = arith.constant 0.000000e+00 : f32
    %108 = vector.broadcast %cst_41 : f32 to vector<1x128xf32>
    %109 = arith.subf %108, %107 : vector<1x128xf32>
    %c0_42 = arith.constant 0 : index
    %c0_43 = arith.constant 0 : index
    %110 = vector.load %arg10[%c0_42, %c0_43] : memref<1x128xf32, #tpu.memory_space<vmem>>, vector<1x128xf32>
    tpu.vector_store %arg10[%c0_42, %c0_43], %109 {strides = array<i32>} : memref<1x128xf32, #tpu.memory_space<vmem>>, vector<1x128xf32>,
    return
  }
  func.func @transform_0(%arg0: i32) -> (i32, i32) {
    %c0_i32 = arith.constant 0 : i32
    %c0_i32_0 = arith.constant 0 : i32
    return %c0_i32, %arg0 : i32, i32
  }
  func.func @transform_1(%arg0: i32) -> (i32, i32) {
    %c0_i32 = arith.constant 0 : i32
    %c0_i32_0 = arith.constant 0 : i32
    return %c0_i32, %arg0 : i32, i32
  }
  func.func @transform_2(%arg0: i32) -> (i32, i32) {
    %c0_i32 = arith.constant 0 : i32
    %c0_i32_0 = arith.constant 0 : i32
    %c0_i32_1 = arith.constant 0 : i32
    return %c0_i32, %c0_i32_0 : i32, i32
  }
  func.func @transform_3(%arg0: i32) -> (i32, i32) {
    %c0_i32 = arith.constant 0 : i32
    %c0_i32_0 = arith.constant 0 : i32
    %c0_i32_1 = arith.constant 0 : i32
    return %c0_i32, %c0_i32_0 : i32, i32
  }
  func.func @transform_4(%arg0: i32) -> (i32, i32) {
    %c0_i32 = arith.constant 0 : i32
    %c0_i32_0 = arith.constant 0 : i32
    %c0_i32_1 = arith.constant 0 : i32
    return %c0_i32, %c0_i32_0 : i32, i32
  }
  func.func @transform_5(%arg0: i32) -> (i32, i32) {
    %c0_i32 = arith.constant 0 : i32
    %c0_i32_0 = arith.constant 0 : i32
    %c0_i32_1 = arith.constant 0 : i32
    return %c0_i32, %c0_i32_0 : i32, i32
  }
  func.func @transform_6(%arg0: i32) -> (i32, i32) {
    %c0_i32 = arith.constant 0 : i32
    %c0_i32_0 = arith.constant 0 : i32
    %c0_i32_1 = arith.constant 0 : i32
    return %c0_i32, %c0_i32_0 : i32, i32
  }
  func.func @transform_7(%arg0: i32) -> (i32, i32) {
    %c0_i32 = arith.constant 0 : i32
    %c0_i32_0 = arith.constant 0 : i32
    %c0_i32_1 = arith.constant 0 : i32
    return %c0_i32, %c0_i32_0 : i32, i32
  }
  func.func @transform_8(%arg0: i32) -> (i32, i32) {
    %c0_i32 = arith.constant 0 : i32
    %c0_i32_0 = arith.constant 0 : i32
    %c0_i32_1 = arith.constant 0 : i32
    return %c0_i32, %c0_i32_0 : i32, i32
  }
  func.func @transform_9(%arg0: i32) -> (i32, i32) {
    %c0_i32 = arith.constant 0 : i32
    %c0_i32_0 = arith.constant 0 : i32
    return %c0_i32, %arg0 : i32, i32
  }
}

</mosaic_0001>

<bundles_post_ra>
// kernel: nvp_forward.1
= control target key start
LH: loop header
LB: loop body
LE: loop exit
PB: predicated region body
PF: predicated region fallthrough
CT: control target
= control target key end

     0   :  { %vm126_vm0 = vcmask 64512   ;;  %v1710_v3 = vmov 0   ;;  %vm264_vm1 = vcmask 523264   ;;  %s2123_s0 = inlined_call_operand.vmem [shape: f32[8,128], index: 0, kind: input, shape index: {}]   ;;  %s2124_s2 = inlined_call_operand.vmem [shape: f32[64,8], index: 2, kind: input, shape index: {}]   ;;  %s2125_s4 = inlined_call_operand.vmem [shape: f32[64,1], index: 4, kind: input, shape index: {}]   ;;  %s2126_s7 = inlined_call_operand.vmem [shape: f32[16,1], index: 7, kind: input, shape index: {}]   ;;  %s2127_s8 = inlined_call_operand.vmem [shape: f32[16,1], index: 8, kind: input, shape index: {}]   ;;  %s2128_s5 = inlined_call_operand.vmem [shape: f32[16,64], index: 5, kind: input, shape index: {}]   ;;  %s2129_s3 = inlined_call_operand.vmem [shape: f32[64,8], index: 3, kind: input, shape index: {}]   ;;  %s2130_s1 = inlined_call_operand.vmem [shape: f32[8,128], index: 1, kind: input, shape index: {}]   ;;  %s2131_s6 = inlined_call_operand.vmem [shape: f32[16,64], index: 6, kind: input, shape index: {}]   ;;  %s2132_s9 = inlined_call_operand.vmem [shape: f32[1,128], index: 9, kind: output, shape index: {}]  }
   0x1   :  { %v1764_v0 = vld [vmem:[%s2123_s0] sm:$0xff]  ;;  %v1774_v2 = vld [vmem:[%s2124_s2 + $0x8] sm:$0xff]  ;;  %1608 = vset.pattern.permute.xlu0 %v1710_v3  ;;  %1609 = vset.pattern.permute.xlu1 %v1710_v3  ;;  %v1782_v4 = vld [vmem:[%s2124_s2 + $0x10] sm:$0xff] }
   0x2   :  { %v1769_v1 = vld [vmem:[%s2124_s2] sm:$0xff]  ;;  %1362 = vmatprep.subr.mxu0 %v1764_v0  ;;  %v56_v6 = vld [vmem:[%s2125_s4 + $0x10] sm:$0xff]  ;;  %v1798_v7 = vld [vmem:[%s2124_s2 + $0x18] sm:$0xff] }
   0x3   :  { %1364 = vmatprep.mubr.msk.f32.mxu0 %vm126_vm0, %v1769_v1  ;;  %1363 = vmatpush3.msra.mxu0 %v1764_v0  ;;  %v54_v5 = vld [vmem:[%s2125_s4] sm:$0xff]  ;;  %v55_v9 = vld [vmem:[%s2125_s4 + $0x8] sm:$0xff]  ;;  %v57_v10 = vld [vmem:[%s2125_s4 + $0x18] sm:$0xff] }
   0x4   :  { %1365 = vmatmul.mubr.msk.f32.vlgmr.msra.gmra.mrb[0].mxu0 %vm126_vm0, %v1774_v2  ;;  %64 = vperm.xlu0 %1608, %v54_v5   ;;  %v1803_v8 = vld [vmem:[%s2124_s2 + $0x20] sm:$0xff]  ;;  %v1818_v11 = vld [vmem:[%s2124_s2 + $0x28] sm:$0xff]  ;;  %v1823_v12 = vld [vmem:[%s2124_s2 + $0x30] sm:$0xff] }
   0x5   :  { %1367 = vmatprep.mubr.msk.f32.mxu0 %vm126_vm0, %v1782_v4  ;;  %74 = vperm.xlu1 %1609, %v56_v6   ;;  %v58_v13 = vld [vmem:[%s2125_s4 + $0x20] sm:$0xff]  ;;  %v59_v14 = vld [vmem:[%s2125_s4 + $0x28] sm:$0xff]  ;;  %v1838_v15 = vld [vmem:[%s2124_s2 + $0x38] sm:$0xff] }
   0x6   :  { %v60_v16 = vld [vmem:[%s2125_s4 + $0x30] sm:$0xff]  ;;  %v61_v17 = vld [vmem:[%s2125_s4 + $0x38] sm:$0xff]  ;;  %v102_v18 = vld [vmem:[%s2126_s7] sm:$0xff] }
   0x7   :  { %v103_v19 = vld [vmem:[%s2126_s7 + $0x8] sm:$0xff]  ;;  %v114_v20 = vld [vmem:[%s2127_s8] sm:$0xff] }
   0x8   :  { %1368 = vmatmul.mubr.msk.f32.gmra.mrb[2].mxu0 %vm126_vm0, %v1798_v7  ;;  %69 = vperm.xlu0 %1608, %v55_v9   ;;  %v115_v21 = vld [vmem:[%s2127_s8 + $0x8] sm:$0xff]  ;;  %v1863_v22 = vld [vmem:[%s2128_s5] sm:$0xff] }
   0x9   :  { %1370 = vmatprep.mubr.msk.f32.mxu0 %vm126_vm0, %v1803_v8  ;;  %79 = vperm.xlu1 %1609, %v57_v10   ;;  %v1894_v59 = vld [vmem:[%s2128_s5 + $0x8] sm:$0xff]  ;;  %v1901_v60 = vld [vmem:[%s2129_s3] sm:$0xff] }
   0xa   :  { %1392 = vmatprep.mubr.msk.f32.mxu1 %vm264_vm1, %v1863_v22 }
   0xc   :  { %1371 = vmatmul.mubr.msk.f32.gmra.mrb[4].mxu0 %vm126_vm0, %v1818_v11  ;;  %84 = vperm.xlu0 %1608, %v58_v13  }
   0xd   :  { %1373 = vmatprep.mubr.msk.f32.mxu0 %vm126_vm0, %v1823_v12  ;;  %89 = vperm.xlu1 %1609, %v59_v14   ;;  %v33_v14 = vld [vmem:[%s2130_s1] sm:$0xff] }
  0x10   :  { %1374 = vmatmul.mubr.msk.f32.gmra.mrb[6].mxu0 %vm126_vm0, %v1838_v15  ;;  %94 = vperm.xlu0 %1608, %v60_v16  }
  0x11   :  { %99 = vperm.xlu1 %1609, %v61_v17   ;;  %1397 = vmatprep.mubr.msk.f32.mxu0 %vm126_vm0, %v1901_v60 }
  0x14   :  { %106 = vperm.xlu0 %1608, %v102_v18  }
  0x15   :  { %111 = vperm.xlu1 %1609, %v103_v19   ;;  %v1922_v19 = vld [vmem:[%s2129_s3 + $0x8] sm:$0xff] }
  0x18   :  { %118 = vperm.xlu0 %1608, %v114_v20   ;;  %v1928_v20 = vld [vmem:[%s2129_s3 + $0x10] sm:$0xff] }
  0x19   :  { %123 = vperm.xlu1 %1609, %v115_v21   ;;  %v1938_v21 = vld [vmem:[%s2129_s3 + $0x18] sm:$0xff] }
  0x83   :  { %v1867_v23 = vpop.permute.xlu0 %64 }
  0x84   :  { %v1869_v24 = vpop.permute.xlu1 %74 }
  0x87   :  { %v1871_v25 = vpop.permute.xlu0 %69 }
  0x88   :  { %v1873_v26 = vpop.permute.xlu1 %79 }
  0x8b   :  { %v1881_v36 = vpop.permute.xlu0 %84 }
  0x8c   :  { %v1878_v34 = vpop.permute.xlu1 %89 }
  0x8f   :  { %v1887_v44 = vpop.permute.xlu0 %94 }
  0x90   :  { %v1885_v41 = vpop.permute.xlu1 %99 }
  0x93   :  { %v1905_v62 = vpop.permute.xlu0 %106 }
  0x94   :  { %v1911_v10 = vpop.permute.xlu1 %111 }
  0xd7   :  { %v1366_v27 = vpop.f32.mrb[0].mxu0 }
  0xd8   :  { %v223_v28 = vadd.f32 %v1366_v27, %v1871_v25  ;;  %v217_v29 = vpop.f32.mrb[1].mxu0  ;;  %v1943_v27 = vld [vmem:[%s2129_s3 + $0x20] sm:$0xff] }
  0xd9   :  { %v218_v30 = vadd.f32 %v217_v29, %v1867_v23  ;;  %v1957_v29 = vld [vmem:[%s2129_s3 + $0x30] sm:$0xff] }
  0xda   :  { %1610 = vtanh.f32 %v223_v28  ;;  %v1952_v28 = vld [vmem:[%s2129_s3 + $0x28] sm:$0xff] }
  0xdb   :  { %1612 = vtanh.f32 %v218_v30  ;;  %v1369_v31 = vpop.f32.mrb[2].mxu0  ;;  %v1966_v30 = vld [vmem:[%s2129_s3 + $0x38] sm:$0xff] }
  0xdc   :  { %v233_v32 = vadd.f32 %v1369_v31, %v1873_v26  ;;  %v227_v33 = vpop.f32.mrb[3].mxu0  ;;  %v1975_v31 = vld [vmem:[%s2131_s6] sm:$0xff] }
  0xdd   :  { %v228_v35 = vadd.f32 %v227_v33, %v1869_v24 }
  0xde   :  { %1614 = vtanh.f32 %v233_v32 }
  0xdf   :  { %1616 = vtanh.f32 %v228_v35  ;;  %v1372_v37 = vpop.f32.mrb[4].mxu0 }
  0xe0   :  { %v243_v38 = vadd.f32 %v1372_v37, %v1878_v34  ;;  %v237_v39 = vpop.f32.mrb[5].mxu0 }
  0xe1   :  { %v238_v40 = vadd.f32 %v237_v39, %v1881_v36 }
  0xe2   :  { %1618 = vtanh.f32 %v243_v38 }
  0xe3   :  { %1620 = vtanh.f32 %v238_v40  ;;  %v1375_v42 = vpop.f32.mrb[6].mxu0 }
  0xe4   :  { %v1611_v43 = vpop.eup %1610  ;;  %v253_v45 = vadd.f32 %v1375_v42, %v1885_v41  ;;  %v247_v46 = vpop.f32.mrb[7].mxu0 }
  0xe5   :  { %v1613_v47 = vpop.eup %1612  ;;  %v248_v48 = vadd.f32 %v247_v46, %v1887_v44 }
  0xe6   :  { %1622 = vtanh.f32 %v253_v45  ;;  %v1527_v49 = vpack.c.bf16 %v1611_v43, %v1613_v47 }
  0xe7   :  { %1624 = vtanh.f32 %v248_v48 }
  0xe8   :  { %v1615_v50 = vpop.eup %1614  ;;  %1528 = vmatprep.subr.bf16.mxu1 %v1527_v49 }
  0xe9   :  { %v1617_v51 = vpop.eup %1616  ;;  %1530 = vmatpush3.bf16.msra.mxu1 %v1527_v49 }
  0xea   :  { %v1531_v52 = vpack.c.bf16 %v1615_v50, %v1617_v51 }
  0xec   :  { %v1619_v53 = vpop.eup %1618  ;;  %1532 = vmatprep.subr.bf16.mxu1 %v1531_v52 }
  0xed   :  { %v1621_v54 = vpop.eup %1620  ;;  %1534 = vmatpush3.bf16.msra.mxu1 %v1531_v52 }
  0xee   :  { %v1535_v55 = vpack.c.bf16 %v1619_v53, %v1621_v54 }
  0xf0   :  { %v1623_v56 = vpop.eup %1622  ;;  %1536 = vmatprep.subr.bf16.mxu1 %v1535_v55 }
  0xf1   :  { %v1625_v57 = vpop.eup %1624  ;;  %1538 = vmatpush3.bf16.msra.mxu1 %v1535_v55 }
  0xf2   :  { %v1539_v58 = vpack.c.bf16 %v1623_v56, %v1625_v57 }
  0xf4   :  { %1540 = vmatprep.subr.bf16.mxu1 %v1539_v58 }
  0xf5   :  { %1542 = vmatpush3.bf16.msra.mxu1 %v1539_v58 }
  0xf8   :  { %1393 = vmatmul.mubr.msk.f32.vlgmr.msra.gmra.mrb[0].mxu1 %vm264_vm1, %v1894_v59 }
  0xf9   :  { %1425 = vmatprep.mubr.msk.f32.mxu1 %vm264_vm1, %v1975_v31 }
 0x1cb   :  { %v1394_v61 = vpop.f32.mrb[0].mxu1 }
 0x1cc   :  { %v337_v63 = vpop.f32.mrb[1].mxu1  ;;  %v343_v13 = vadd.f32 %v1394_v61, %v1911_v10 }
 0x1cd   :  { %v338_v3 = vadd.f32 %v337_v63, %v1905_v62 }
 0x1ce   :  { %v347_v16 = vsub.f32 %v33_v14, %v343_v13  ;;  %v1990_v13 = vld [vmem:[%s2131_s6 + $0x8] sm:$0xff] }
 0x1cf   :  { %1626 = vtanh.f32 %v338_v3 }
 0x1d9   :  { %v1908_v5 = vpop.eup %1626 }
 0x1da   :  { %v348_v6 = vsub.f32 0.0, %v1908_v5 }
 0x1dc   :  { %v349_v9 = vmul.f32 1.442695, %v348_v6 }
 0x1de   :  { %1628 = vpow2.f32 %v349_v9 }
 0x1e8   :  { %v1629_v17 = vpop.eup %1628 }
 0x1e9   :  { %v1917_v18 = vmul.f32 %v1629_v17, %v347_v16  ;;  %v1996_v16 = vpop.permute.xlu0 %118  ;;  %v352_v17 = vrot.slane %v1908_v5, 4 }
 0x1eb   :  { %1395 = vmatprep.subr.mxu0 %v1917_v18 }
 0x1ec   :  { %1396 = vmatpush3.msra.mxu0 %v1917_v18 }
 0x1ed   :  { %1398 = vmatmul.mubr.msk.f32.vlgmr.msra.gmra.mrb[8].mxu0 %vm126_vm0, %v1922_v19 }
 0x1ee   :  { %1400 = vmatprep.mubr.msk.f32.mxu0 %vm126_vm0, %v1928_v20 }
 0x1f1   :  { %1401 = vmatmul.mubr.msk.f32.gmra.mrb[10].mxu0 %vm126_vm0, %v1938_v21 }
 0x1f2   :  { %1403 = vmatprep.mubr.msk.f32.mxu0 %vm126_vm0, %v1943_v27 }
 0x1f5   :  { %1404 = vmatmul.mubr.msk.f32.gmra.mrb[12].mxu0 %vm126_vm0, %v1952_v28 }
 0x1f6   :  { %1406 = vmatprep.mubr.msk.f32.mxu0 %vm126_vm0, %v1957_v29 }
 0x1f9   :  { %1407 = vmatmul.mubr.msk.f32.gmra.mrb[14].mxu0 %vm126_vm0, %v1966_v30 }
 0x1fa   :  { %1430 = vmatprep.mubr.msk.f32.mxu0 %vm126_vm0, %v1769_v1 }
 0x2c0   :  { %v1399_v32 = vpop.f32.mrb[8].mxu0 }
 0x2c1   :  { %v455_v33 = vadd.f32 %v1399_v32, %v1871_v25  ;;  %v449_v35 = vpop.f32.mrb[9].mxu0 }
 0x2c2   :  { %v450_v37 = vadd.f32 %v449_v35, %v1867_v23  ;;  %v353_v35 = vadd.f32 %v1908_v5, %v352_v17 }
 0x2c3   :  { %1630 = vtanh.f32 %v455_v33 }
 0x2c4   :  { %1632 = vtanh.f32 %v450_v37  ;;  %v1402_v38 = vpop.f32.mrb[10].mxu0  ;;  %v354_v37 = vrot.slane %v353_v35, 2 }
 0x2c5   :  { %v465_v39 = vadd.f32 %v1402_v38, %v1873_v26  ;;  %v459_v40 = vpop.f32.mrb[11].mxu0 }
 0x2c6   :  { %v460_v42 = vadd.f32 %v459_v40, %v1869_v24  ;;  %v355_v38 = vadd.f32 %v354_v37, %v353_v35 }
 0x2c7   :  { %1634 = vtanh.f32 %v465_v39 }
 0x2c8   :  { %1636 = vtanh.f32 %v460_v42  ;;  %v1405_v43 = vpop.f32.mrb[12].mxu0 }
 0x2c9   :  { %v475_v45 = vadd.f32 %v1405_v43, %v1878_v34  ;;  %v469_v46 = vpop.f32.mrb[13].mxu0  ;;  %v356_v43 = vrot.slane %v355_v38, 1 }
 0x2ca   :  { %v470_v47 = vadd.f32 %v469_v46, %v1881_v36 }
 0x2cb   :  { %1638 = vtanh.f32 %v475_v45 }
 0x2cc   :  { %1640 = vtanh.f32 %v470_v47  ;;  %v1408_v48 = vpop.f32.mrb[14].mxu0 }
 0x2cd   :  { %v1631_v49 = vpop.eup %1630  ;;  %v485_v50 = vadd.f32 %v1408_v48, %v1885_v41  ;;  %v479_v51 = vpop.f32.mrb[15].mxu0  ;;  %v357_v48 = vadd.f32 %v356_v43, %v355_v38 }
 0x2ce   :  { %v1633_v52 = vpop.eup %1632  ;;  %v480_v53 = vadd.f32 %v479_v51, %v1887_v44 }
 0x2cf   :  { %1642 = vtanh.f32 %v485_v50  ;;  %v1543_v54 = vpack.c.bf16 %v1631_v49, %v1633_v52  ;;  %v2001_v50 = vpop.permute.xlu1 %123 }
 0x2d0   :  { %1644 = vtanh.f32 %v480_v53  ;;  %v358_v53 = vsub.f32 0.0, %v357_v48 }
 0x2d1   :  { %v1635_v55 = vpop.eup %1634  ;;  %1544 = vmatprep.subr.bf16.mxu1 %v1543_v54 }
 0x2d2   :  { %v1637_v56 = vpop.eup %1636  ;;  %1546 = vmatpush3.bf16.msra.mxu1 %v1543_v54 }
 0x2d3   :  { %v1547_v57 = vpack.c.bf16 %v1635_v55, %v1637_v56 }
 0x2d5   :  { %v1639_v58 = vpop.eup %1638  ;;  %1548 = vmatprep.subr.bf16.mxu1 %v1547_v57 }
 0x2d6   :  { %v1641_v61 = vpop.eup %1640  ;;  %1550 = vmatpush3.bf16.msra.mxu1 %v1547_v57 }
 0x2d7   :  { %v1551_v63 = vpack.c.bf16 %v1639_v58, %v1641_v61 }
 0x2d9   :  { %v1643_v3 = vpop.eup %1642  ;;  %1552 = vmatprep.subr.bf16.mxu1 %v1551_v63 }
 0x2da   :  { %v1645_v6 = vpop.eup %1644  ;;  %1554 = vmatpush3.bf16.msra.mxu1 %v1551_v63 }
 0x2db   :  { %v1555_v9 = vpack.c.bf16 %v1643_v3, %v1645_v6 }
 0x2dd   :  { %1556 = vmatprep.subr.bf16.mxu1 %v1555_v9 }
 0x2de   :  { %1558 = vmatpush3.bf16.msra.mxu1 %v1555_v9 }
 0x2e1   :  { %1426 = vmatmul.mubr.msk.f32.vlgmr.msra.gmra.mrb[2].mxu1 %vm264_vm1, %v1990_v13 }
 0x2e2   :  { %1458 = vmatprep.mubr.msk.f32.mxu1 %vm264_vm1, %v1863_v22 }
 0x3b4   :  { %v1427_v14 = vpop.f32.mrb[2].mxu1 }
 0x3b5   :  { %v568_v32 = vpop.f32.mrb[3].mxu1  ;;  %v574_v52 = vadd.f32 %v1427_v14, %v2001_v50 }
 0x3b6   :  { %v569_v33 = vadd.f32 %v568_v32, %v1996_v16 }
 0x3b7   :  { %v578_v55 = vsub.f32 %v1764_v0, %v574_v52 }
 0x3b8   :  { %1646 = vtanh.f32 %v569_v33 }
 0x3c2   :  { %v1647_v39 = vpop.eup %1646 }
 0x3c3   :  { %v583_v40 = vrot.slane %v1647_v39, 4  ;;  %v579_v42 = vsub.f32 0.0, %v1647_v39 }
 0x3c5   :  { %v584_v45 = vadd.f32 %v1647_v39, %v583_v40  ;;  %v580_v46 = vmul.f32 1.442695, %v579_v42 }
 0x3c7   :  { %v585_v47 = vrot.slane %v584_v45, 2  ;;  %1648 = vpow2.f32 %v580_v46 }
 0x3c9   :  { %v586_v49 = vadd.f32 %v585_v47, %v584_v45 }
 0x3cb   :  { %v587_v51 = vrot.slane %v586_v49, 1 }
 0x3cd   :  { %v588_v54 = vadd.f32 %v587_v51, %v586_v49 }
 0x3cf   :  { %v2004_v5 = vsub.f32 %v358_v53, %v588_v54 }
 0x3d1   :  { %v1649_v56 = vpop.eup %1648 }
 0x3d2   :  { %v2007_v57 = vmul.f32 %v1649_v56, %v578_v55 }
 0x3d4   :  { %1428 = vmatprep.subr.mxu0 %v2007_v57 }
 0x3d5   :  { %1429 = vmatpush3.msra.mxu0 %v2007_v57 }
 0x3d6   :  { %1431 = vmatmul.mubr.msk.f32.vlgmr.msra.gmra.mrb[16].mxu0 %vm126_vm0, %v1774_v2 }
 0x3d7   :  { %1433 = vmatprep.mubr.msk.f32.mxu0 %vm126_vm0, %v1782_v4 }
 0x3da   :  { %1434 = vmatmul.mubr.msk.f32.gmra.mrb[18].mxu0 %vm126_vm0, %v1798_v7 }
 0x3db   :  { %1436 = vmatprep.mubr.msk.f32.mxu0 %vm126_vm0, %v1803_v8 }
 0x3de   :  { %1437 = vmatmul.mubr.msk.f32.gmra.mrb[20].mxu0 %vm126_vm0, %v1818_v11 }
 0x3df   :  { %1439 = vmatprep.mubr.msk.f32.mxu0 %vm126_vm0, %v1823_v12 }
 0x3e2   :  { %1440 = vmatmul.mubr.msk.f32.gmra.mrb[22].mxu0 %vm126_vm0, %v1838_v15 }
 0x3e3   :  { %1463 = vmatprep.mubr.msk.f32.mxu0 %vm126_vm0, %v1901_v60 }
 0x4a9   :  { %v1432_v0 = vpop.f32.mrb[16].mxu0 }
 0x4aa   :  { %v662_v58 = vadd.f32 %v1432_v0, %v1871_v25  ;;  %v656_v61 = vpop.f32.mrb[17].mxu0 }
 0x4ab   :  { %v657_v63 = vadd.f32 %v656_v61, %v1867_v23 }
 0x4ac   :  { %1650 = vtanh.f32 %v662_v58 }
 0x4ad   :  { %1652 = vtanh.f32 %v657_v63  ;;  %v1435_v3 = vpop.f32.mrb[18].mxu0 }
 0x4ae   :  { %v672_v6 = vadd.f32 %v1435_v3, %v1873_v26  ;;  %v666_v9 = vpop.f32.mrb[19].mxu0 }
 0x4af   :  { %v667_v14 = vadd.f32 %v666_v9, %v1869_v24 }
 0x4b0   :  { %1654 = vtanh.f32 %v672_v6 }
 0x4b1   :  { %1656 = vtanh.f32 %v667_v14  ;;  %v1438_v17 = vpop.f32.mrb[20].mxu0 }
 0x4b2   :  { %v682_v32 = vadd.f32 %v1438_v17, %v1878_v34  ;;  %v676_v60 = vpop.f32.mrb[21].mxu0 }
 0x4b3   :  { %v677_v33 = vadd.f32 %v676_v60, %v1881_v36 }
 0x4b4   :  { %1658 = vtanh.f32 %v682_v32 }
 0x4b5   :  { %1660 = vtanh.f32 %v677_v33  ;;  %v1441_v35 = vpop.f32.mrb[22].mxu0 }
 0x4b6   :  { %v1651_v37 = vpop.eup %1650  ;;  %v692_v38 = vadd.f32 %v1441_v35, %v1885_v41  ;;  %v686_v39 = vpop.f32.mrb[23].mxu0 }
 0x4b7   :  { %v1653_v40 = vpop.eup %1652  ;;  %v687_v42 = vadd.f32 %v686_v39, %v1887_v44 }
 0x4b8   :  { %1662 = vtanh.f32 %v692_v38  ;;  %v1559_v43 = vpack.c.bf16 %v1651_v37, %v1653_v40 }
 0x4b9   :  { %1664 = vtanh.f32 %v687_v42 }
 0x4ba   :  { %v1655_v45 = vpop.eup %1654  ;;  %1560 = vmatprep.subr.bf16.mxu1 %v1559_v43 }
 0x4bb   :  { %v1657_v46 = vpop.eup %1656  ;;  %1562 = vmatpush3.bf16.msra.mxu1 %v1559_v43 }
 0x4bc   :  { %v1563_v47 = vpack.c.bf16 %v1655_v45, %v1657_v46 }
 0x4be   :  { %v1659_v48 = vpop.eup %1658  ;;  %1564 = vmatprep.subr.bf16.mxu1 %v1563_v47 }
 0x4bf   :  { %v1661_v49 = vpop.eup %1660  ;;  %1566 = vmatpush3.bf16.msra.mxu1 %v1563_v47 }
 0x4c0   :  { %v1567_v51 = vpack.c.bf16 %v1659_v48, %v1661_v49 }
 0x4c2   :  { %v1663_v52 = vpop.eup %1662  ;;  %1568 = vmatprep.subr.bf16.mxu1 %v1567_v51 }
 0x4c3   :  { %v1665_v53 = vpop.eup %1664  ;;  %1570 = vmatpush3.bf16.msra.mxu1 %v1567_v51 }
 0x4c4   :  { %v1571_v54 = vpack.c.bf16 %v1663_v52, %v1665_v53 }
 0x4c6   :  { %1572 = vmatprep.subr.bf16.mxu1 %v1571_v54 }
 0x4c7   :  { %1574 = vmatpush3.bf16.msra.mxu1 %v1571_v54 }
 0x4ca   :  { %1459 = vmatmul.mubr.msk.f32.vlgmr.msra.gmra.mrb[4].mxu1 %vm264_vm1, %v1894_v59 }
 0x4cb   :  { %1491 = vmatprep.mubr.msk.f32.mxu1 %vm264_vm1, %v1975_v31 }
 0x59d   :  { %v1460_v55 = vpop.f32.mrb[4].mxu1 }
 0x59e   :  { %v769_v56 = vpop.f32.mrb[5].mxu1  ;;  %v775_v32 = vadd.f32 %v1460_v55, %v1911_v10 }
 0x59f   :  { %v770_v0 = vadd.f32 %v769_v56, %v1905_v62 }
 0x5a0   :  { %v779_v33 = vsub.f32 %v1917_v18, %v775_v32 }
 0x5a1   :  { %1666 = vtanh.f32 %v770_v0 }
 0x5ab   :  { %v1667_v58 = vpop.eup %1666 }
 0x5ac   :  { %v784_v61 = vrot.slane %v1667_v58, 4  ;;  %v780_v63 = vsub.f32 0.0, %v1667_v58 }
 0x5ae   :  { %v785_v3 = vadd.f32 %v1667_v58, %v784_v61  ;;  %v781_v6 = vmul.f32 1.442695, %v780_v63 }
 0x5b0   :  { %v786_v9 = vrot.slane %v785_v3, 2  ;;  %1668 = vpow2.f32 %v781_v6 }
 0x5b2   :  { %v787_v14 = vadd.f32 %v786_v9, %v785_v3 }
 0x5b4   :  { %v788_v17 = vrot.slane %v787_v14, 1 }
 0x5b6   :  { %v2041_v60 = vadd.f32 %v788_v17, %v787_v14 }
 0x5b8   :  { %v790_v31 = vsub.f32 %v2004_v5, %v2041_v60 }
 0x5ba   :  { %v1669_v35 = vpop.eup %1668 }
 0x5bb   :  { %v2046_v37 = vmul.f32 %v1669_v35, %v779_v33 }
 0x5bd   :  { %1461 = vmatprep.subr.mxu0 %v2046_v37 }
 0x5be   :  { %1462 = vmatpush3.msra.mxu0 %v2046_v37 }
 0x5bf   :  { %1464 = vmatmul.mubr.msk.f32.vlgmr.msra.gmra.mrb[24].mxu0 %vm126_vm0, %v1922_v19 }
 0x5c0   :  { %1466 = vmatprep.mubr.msk.f32.mxu0 %vm126_vm0, %v1928_v20 }
 0x5c3   :  { %1467 = vmatmul.mubr.msk.f32.gmra.mrb[26].mxu0 %vm126_vm0, %v1938_v21 }
 0x5c4   :  { %1469 = vmatprep.mubr.msk.f32.mxu0 %vm126_vm0, %v1943_v27 }
 0x5c7   :  { %1470 = vmatmul.mubr.msk.f32.gmra.mrb[28].mxu0 %vm126_vm0, %v1952_v28 }
 0x5c8   :  { %1472 = vmatprep.mubr.msk.f32.mxu0 %vm126_vm0, %v1957_v29 }
 0x5cb   :  { %1473 = vmatmul.mubr.msk.f32.gmra.mrb[30].mxu0 %vm126_vm0, %v1966_v30 }
 0x5cc   :  { %1496 = vmatprep.mubr.msk.f32.mxu0 %vm126_vm0, %v1769_v1 }
 0x692   :  { %v1465_v18 = vpop.f32.mrb[24].mxu0 }
 0x693   :  { %v863_v19 = vadd.f32 %v1465_v18, %v1871_v25  ;;  %v857_v20 = vpop.f32.mrb[25].mxu0 }
 0x694   :  { %v858_v21 = vadd.f32 %v857_v20, %v1867_v23 }
 0x695   :  { %1670 = vtanh.f32 %v863_v19 }
 0x696   :  { %1672 = vtanh.f32 %v858_v21  ;;  %v1468_v27 = vpop.f32.mrb[26].mxu0 }
 0x697   :  { %v873_v28 = vadd.f32 %v1468_v27, %v1873_v26  ;;  %v867_v38 = vpop.f32.mrb[27].mxu0 }
 0x698   :  { %v868_v29 = vadd.f32 %v867_v38, %v1869_v24 }
 0x699   :  { %1674 = vtanh.f32 %v873_v28 }
 0x69a   :  { %1676 = vtanh.f32 %v868_v29  ;;  %v1471_v30 = vpop.f32.mrb[28].mxu0 }
 0x69b   :  { %v883_v39 = vadd.f32 %v1471_v30, %v1878_v34  ;;  %v877_v1 = vpop.f32.mrb[29].mxu0 }
 0x69c   :  { %v878_v40 = vadd.f32 %v877_v1, %v1881_v36 }
 0x69d   :  { %1678 = vtanh.f32 %v883_v39 }
 0x69e   :  { %1680 = vtanh.f32 %v878_v40  ;;  %v1474_v42 = vpop.f32.mrb[30].mxu0 }
 0x69f   :  { %v1671_v43 = vpop.eup %1670  ;;  %v893_v45 = vadd.f32 %v1474_v42, %v1885_v41  ;;  %v887_v46 = vpop.f32.mrb[31].mxu0 }
 0x6a0   :  { %v1673_v47 = vpop.eup %1672  ;;  %v888_v48 = vadd.f32 %v887_v46, %v1887_v44 }
 0x6a1   :  { %1682 = vtanh.f32 %v893_v45  ;;  %v1575_v49 = vpack.c.bf16 %v1671_v43, %v1673_v47 }
 0x6a2   :  { %1684 = vtanh.f32 %v888_v48 }
 0x6a3   :  { %v1675_v51 = vpop.eup %1674  ;;  %1576 = vmatprep.subr.bf16.mxu1 %v1575_v49 }
 0x6a4   :  { %v1677_v52 = vpop.eup %1676  ;;  %1578 = vmatpush3.bf16.msra.mxu1 %v1575_v49 }
 0x6a5   :  { %v1579_v53 = vpack.c.bf16 %v1675_v51, %v1677_v52 }
 0x6a7   :  { %v1679_v54 = vpop.eup %1678  ;;  %1580 = vmatprep.subr.bf16.mxu1 %v1579_v53 }
 0x6a8   :  { %v1681_v55 = vpop.eup %1680  ;;  %1582 = vmatpush3.bf16.msra.mxu1 %v1579_v53 }
 0x6a9   :  { %v1583_v56 = vpack.c.bf16 %v1679_v54, %v1681_v55 }
 0x6ab   :  { %v1683_v0 = vpop.eup %1682  ;;  %1584 = vmatprep.subr.bf16.mxu1 %v1583_v56 }
 0x6ac   :  { %v1685_v58 = vpop.eup %1684  ;;  %1586 = vmatpush3.bf16.msra.mxu1 %v1583_v56 }
 0x6ad   :  { %v1587_v61 = vpack.c.bf16 %v1683_v0, %v1685_v58 }
 0x6af   :  { %1588 = vmatprep.subr.bf16.mxu1 %v1587_v61 }
 0x6b0   :  { %1590 = vmatpush3.bf16.msra.mxu1 %v1587_v61 }
 0x6b3   :  { %1492 = vmatmul.mubr.msk.f32.vlgmr.msra.gmra.mrb[6].mxu1 %vm264_vm1, %v1990_v13 }
 0x6b4   :  { %1524 = vmatprep.mubr.msk.f32.mxu1 %vm264_vm1, %v1863_v22 }
 0x786   :  { %v1493_v63 = vpop.f32.mrb[6].mxu1 }
 0x787   :  { %v970_v3 = vpop.f32.mrb[7].mxu1  ;;  %v976_v20 = vadd.f32 %v1493_v63, %v2001_v50 }
 0x788   :  { %v971_v6 = vadd.f32 %v970_v3, %v1996_v16 }
 0x789   :  { %v980_v16 = vsub.f32 %v2007_v57, %v976_v20 }
 0x78a   :  { %1686 = vtanh.f32 %v971_v6 }
 0x794   :  { %v1687_v9 = vpop.eup %1686 }
 0x795   :  { %v985_v14 = vrot.slane %v1687_v9, 4  ;;  %v981_v17 = vsub.f32 0.0, %v1687_v9 }
 0x797   :  { %v986_v32 = vadd.f32 %v1687_v9, %v985_v14  ;;  %v982_v33 = vmul.f32 1.442695, %v981_v17 }
 0x799   :  { %v987_v35 = vrot.slane %v986_v32, 2  ;;  %1688 = vpow2.f32 %v982_v33 }
 0x79b   :  { %v988_v18 = vadd.f32 %v987_v35, %v986_v32 }
 0x79d   :  { %v989_v19 = vrot.slane %v988_v18, 1 }
 0x79f   :  { %v990_v13 = vadd.f32 %v989_v19, %v988_v18 }
 0x7a1   :  { %v2083_v22 = vsub.f32 %v790_v31, %v990_v13 }
 0x7a3   :  { %v1689_v21 = vpop.eup %1688 }
 0x7a4   :  { %v2086_v27 = vmul.f32 %v1689_v21, %v980_v16 }
 0x7a6   :  { %1494 = vmatprep.subr.mxu0 %v2086_v27  ;;  %v1200_v54 = vmul.f32 %v2086_v27, %v2086_v27 }
 0x7a7   :  { %1495 = vmatpush3.msra.mxu0 %v2086_v27 }
 0x7a8   :  { %1497 = vmatmul.mubr.msk.f32.vlgmr.msra.gmra.mrb[32].mxu0 %vm126_vm0, %v1774_v2  ;;  %v1201_v0 = vrot.slane %v1200_v54, 4 }
 0x7a9   :  { %1499 = vmatprep.mubr.msk.f32.mxu0 %vm126_vm0, %v1782_v4 }
 0x7ac   :  { %1500 = vmatmul.mubr.msk.f32.gmra.mrb[34].mxu0 %vm126_vm0, %v1798_v7 }
 0x7ad   :  { %1502 = vmatprep.mubr.msk.f32.mxu0 %vm126_vm0, %v1803_v8 }
 0x7b0   :  { %1503 = vmatmul.mubr.msk.f32.gmra.mrb[36].mxu0 %vm126_vm0, %v1818_v11 }
 0x7b1   :  { %1505 = vmatprep.mubr.msk.f32.mxu0 %vm126_vm0, %v1823_v12 }
 0x7b4   :  { %1506 = vmatmul.mubr.msk.f32.gmra.mrb[38].mxu0 %vm126_vm0, %v1838_v15 }
 0x87b   :  { %v1498_v50 = vpop.f32.mrb[32].mxu0 }
 0x87c   :  { %v1064_v2 = vadd.f32 %v1498_v50, %v1871_v25  ;;  %v1058_v5 = vpop.f32.mrb[33].mxu0 }
 0x87d   :  { %v1059_v4 = vadd.f32 %v1058_v5, %v1867_v23 }
 0x87e   :  { %1690 = vtanh.f32 %v1064_v2 }
 0x87f   :  { %1692 = vtanh.f32 %v1059_v4  ;;  %v1501_v7 = vpop.f32.mrb[34].mxu0 }
 0x880   :  { %v1074_v8 = vadd.f32 %v1501_v7, %v1873_v26  ;;  %v1068_v57 = vpop.f32.mrb[35].mxu0 }
 0x881   :  { %v1069_v11 = vadd.f32 %v1068_v57, %v1869_v24 }
 0x882   :  { %1694 = vtanh.f32 %v1074_v8 }
 0x883   :  { %1696 = vtanh.f32 %v1069_v11  ;;  %v1504_v12 = vpop.f32.mrb[36].mxu0 }
 0x884   :  { %v1084_v60 = vadd.f32 %v1504_v12, %v1878_v34  ;;  %v1078_v15 = vpop.f32.mrb[37].mxu0 }
 0x885   :  { %v1079_v31 = vadd.f32 %v1078_v15, %v1881_v36 }
 0x886   :  { %1698 = vtanh.f32 %v1084_v60 }
 0x887   :  { %1700 = vtanh.f32 %v1079_v31  ;;  %v1507_v25 = vpop.f32.mrb[38].mxu0 }
 0x888   :  { %v1691_v23 = vpop.eup %1690  ;;  %v1094_v28 = vadd.f32 %v1507_v25, %v1885_v41  ;;  %v1088_v38 = vpop.f32.mrb[39].mxu0 }
 0x889   :  { %v1693_v29 = vpop.eup %1692  ;;  %v1089_v26 = vadd.f32 %v1088_v38, %v1887_v44 }
 0x88a   :  { %1702 = vtanh.f32 %v1094_v28  ;;  %v1591_v24 = vpack.c.bf16 %v1691_v23, %v1693_v29 }
 0x88b   :  { %1704 = vtanh.f32 %v1089_v26 }
 0x88c   :  { %v1695_v30 = vpop.eup %1694  ;;  %1592 = vmatprep.subr.bf16.mxu1 %v1591_v24 }
 0x88d   :  { %v1697_v39 = vpop.eup %1696  ;;  %1594 = vmatpush3.bf16.msra.mxu1 %v1591_v24 }
 0x88e   :  { %v1595_v34 = vpack.c.bf16 %v1695_v30, %v1697_v39 }
 0x890   :  { %v1699_v1 = vpop.eup %1698  ;;  %1596 = vmatprep.subr.bf16.mxu1 %v1595_v34 }
 0x891   :  { %v1701_v36 = vpop.eup %1700  ;;  %1598 = vmatpush3.bf16.msra.mxu1 %v1595_v34 }
 0x892   :  { %v1599_v40 = vpack.c.bf16 %v1699_v1, %v1701_v36 }
 0x894   :  { %v1703_v42 = vpop.eup %1702  ;;  %1600 = vmatprep.subr.bf16.mxu1 %v1599_v40 }
 0x895   :  { %v1705_v41 = vpop.eup %1704  ;;  %1602 = vmatpush3.bf16.msra.mxu1 %v1599_v40 }
 0x896   :  { %v1603_v43 = vpack.c.bf16 %v1703_v42, %v1705_v41 }
 0x898   :  { %1604 = vmatprep.subr.bf16.mxu1 %v1603_v43 }
 0x899   :  { %1606 = vmatpush3.bf16.msra.mxu1 %v1603_v43 }
 0x89c   :  { %1525 = vmatmul.mubr.msk.f32.vlgmr.msra.gmra.mrb[8].mxu1 %vm264_vm1, %v1894_v59 }
 0x96f   :  { %v1526_v44 = vpop.f32.mrb[8].mxu1 }
 0x970   :  { %v1171_v45 = vpop.f32.mrb[9].mxu1  ;;  %v1177_v59 = vadd.f32 %v1526_v44, %v1911_v10 }
 0x971   :  { %v1172_v46 = vadd.f32 %v1171_v45, %v1905_v62  ;;  %v1202_v62 = vadd.f32 %v1201_v0, %v1200_v54 }
 0x972   :  { %v1181_v63 = vsub.f32 %v2046_v37, %v1177_v59 }
 0x973   :  { %1706 = vtanh.f32 %v1172_v46  ;;  %v1203_v9 = vrot.slane %v1202_v62, 2 }
 0x975   :  { %v1204_v32 = vadd.f32 %v1203_v9, %v1202_v62 }
 0x977   :  { %v1205_v18 = vrot.slane %v1204_v32, 1 }
 0x979   :  { %v1206_v13 = vadd.f32 %v1205_v18, %v1204_v32 }
 0x97d   :  { %v1707_v47 = vpop.eup %1706 }
 0x97e   :  { %v1182_v48 = vsub.f32 0.0, %v1707_v47  ;;  %v1186_v49 = vrot.slane %v1707_v47, 4 }
 0x980   :  { %v1183_v51 = vmul.f32 1.442695, %v1182_v48  ;;  %v1187_v52 = vadd.f32 %v1707_v47, %v1186_v49 }
 0x982   :  { %1708 = vpow2.f32 %v1183_v51  ;;  %v1188_v53 = vrot.slane %v1187_v52, 2 }
 0x984   :  { %v1189_v55 = vadd.f32 %v1188_v53, %v1187_v52 }
 0x986   :  { %v1190_v56 = vrot.slane %v1189_v55, 1 }
 0x988   :  { %v1191_v58 = vadd.f32 %v1190_v56, %v1189_v55 }
 0x98a   :  { %v1192_v61 = vsub.f32 %v2083_v22, %v1191_v58 }
 0x98c   :  { %v1709_v3 = vpop.eup %1708 }
 0x98d   :  { %v1185_v6 = vmul.f32 %v1709_v3, %v1181_v63 }
 0x98f   :  { %v1193_v14 = vmul.f32 %v1185_v6, %v1185_v6 }
 0x991   :  { %v1194_v17 = vrot.slane %v1193_v14, 4 }
 0x993   :  { %v1195_v33 = vadd.f32 %v1194_v17, %v1193_v14 }
 0x995   :  { %v1196_v35 = vrot.slane %v1195_v33, 2 }
 0x997   :  { %v1197_v19 = vadd.f32 %v1196_v35, %v1195_v33 }
 0x999   :  { %v1198_v20 = vrot.slane %v1197_v19, 1 }
 0x99b   :  { %v1199_v16 = vadd.f32 %v1198_v20, %v1197_v19 }
 0x99d   :  { %v1207_v10 = vadd.f32 %v1206_v13, %v1199_v16 }
 0x99f   :  { %v1208_v21 = vmul.f32 0.5, %v1207_v10 }
 0x9a1   :  { %v1209_v27 = vsub.f32 -14.703016, %v1208_v21 }
 0x9a3   :  { %v1210_v22 = vadd.f32 %v1209_v27, %v1192_v61 }
 0x9a5   :  { %v1211_v50 = vsub.f32 0.0, %v1210_v22 }
 0x9a7   :  { %1212 = vst [vmem:[%s2132_s9] sm:$0x1] %v1211_v50 }

</bundles_post_ra>
